<compile_context>
chip_gen: v7x
topology: tpu7x:2x2x1
jax: 0.10.0
libtpu: 0.0.40
codegen_flags: <defaults>
</compile_context>

<pallas_src>
import math

import jax
import jax.numpy as jnp
from jax.experimental import pallas as pl
from jax.experimental.pallas import tpu as pltpu


# ---------------------------------------------------------------------------
# VMEM capacity / tile selection helpers
# ---------------------------------------------------------------------------
def _vmem_capacity_bytes():
    try:
        return int(pltpu.get_tpu_info().vmem_capacity_bytes)
    except Exception:
        return 64 * 1024 * 1024          # conservative default (v7x per-core VMEM)


def _round_up(x, m):
    return ((x + m - 1) // m) * m


def _maybe_pad(dim, mult, full_ok_limit):
    """Keep `dim` if it is aligned or small enough for a single full-extent
    block; otherwise pad it up to a multiple of `mult` (padding is zero-filled
    in the wrapper and sliced off afterwards)."""
    if dim % mult == 0 or dim <= full_ok_limit:
        return dim
    return _round_up(dim, mult)


def _axis_candidates(dim, mult, cap):
    """Aligned divisors of `dim` (multiples of `mult`, <= cap), plus the full
    dim as a fallback (a full-extent block is always layout-legal)."""
    cands = set()
    t = (min(dim, cap) // mult) * mult
    while t >= mult:
        if dim % t == 0:
            cands.add(t)
        t -= mult
    cands.add(dim)
    return sorted(cands, reverse=True)


def _fk_candidates(f, cap=128):
    # Prefer multiples of 16 (bf16 sublane packing), then 8; full F as fallback.
    c16 = [d for d in _axis_candidates(f, 16, cap) if d != f]
    c8 = [d for d in _axis_candidates(f, 8, cap) if d != f]
    return sorted(set((c16 or c8) + [f]), reverse=True)


def _working_set_bytes(bt, fk, tn, f, n):
    return (2 * bt * fk * n * 2          # x blocks (bf16, double-buffered)
            + 2 * bt * n * n * 2         # adjacency blocks (bf16)
            + 2 * fk * n * tn * 2        # weight blocks (bf16)
            + 2 * bt * tn * 4            # output blocks (f32)
            + bt * tn * 4                # f32 accumulator scratch
            + bt * f * n * 2)            # fg cache scratch (bf16)


def _pick_tiles(b, f, n, fo, budget):
    bt_cands = _axis_candidates(b, 8, 64)
    fk_cands = _fk_candidates(f, 128)
    tn_cands = _axis_candidates(fo, 128, 2048)
    best = None
    for bt in bt_cands:
        for fk in fk_cands:
            for tn in tn_cands:
                if _working_set_bytes(bt, fk, tn, f, n) > budget:
                    continue
                steps = (b // bt) * (fo // tn) * (f // fk)
                # Fewest grid steps first; prefer 256-aligned output tiles
                # (v6e/v7x MXU columns), then larger batch blocks.
                score = (steps, 0 if tn % 256 == 0 else 1, -bt, -tn, -fk)
                if best is None or score < best[0]:
                    best = (score, (bt, fk, tn))
    if best is not None:
        return best[1]
    # Nothing fits the soft budget; fall back to the smallest legal tiles.
    # TODO(synk): if F*N is too large even for the fg VMEM cache, fall back to
    # recomputing fg per output tile instead of caching it.
    return min(bt_cands), min(fk_cands), min(tn_cands)


# ---------------------------------------------------------------------------
# Fused kernel: grid = (B/bt, FO/tn, F/fk); per step (b, j, k)
#   x_ref : (bt, fk, N)   bf16   feature rows [k*fk, (k+1)*fk) for batch block b
#   a_ref : (bt, N, N)    bf16   adjacency for batch block b
#   w_ref : (fk*N, tn)    bf16   weight rows [k*fk*N, (k+1)*fk*N), cols [j*tn, ...)
#   o_ref : (bt, tn)      f32    output tile
#   acc   : (bt, tn)      f32    VMEM accumulator over the k (reduction) axis
#   fg    : (F/fk, bt, fk*N) bf16 VMEM cache of fg = inputs @ adj, reused across j
# ---------------------------------------------------------------------------
def _gconv_kernel(x_ref, a_ref, w_ref, o_ref, acc_ref, fg_ref):
    j = pl.program_id(1)
    k = pl.program_id(2)
    bt, fk, n = x_ref.shape

    @pl.when(k == 0)
    def _init():
        acc_ref[...] = jnp.zeros_like(acc_ref)

    # fg = inputs @ adj depends only on (batch block, k): compute it once with a
    # batched MXU einsum on the first output tile (j == 0) and cache it
    # flattened to (bt, fk*N), matching the row order of the flat weight.
    @pl.when(j == 0)
    def _compute_fg():
        fg = jnp.einsum("bfn,bnm->bfm", x_ref[...], a_ref[...],
                        preferred_element_type=jnp.float32).astype(jnp.bfloat16)
        for df in range(fk):             # static unroll; runs once per (b, k)
            fg_ref[k, :, df * n:(df + 1) * n] = fg[:, df, :]

    # Second GEMM: a single full (bt, fk*N) @ (fk*N, tn) MXU dot per grid step,
    # f32-accumulated in VMEM and written back once on the last k step.
    acc_ref[...] += jnp.dot(fg_ref[k], w_ref[...],
                            preferred_element_type=jnp.float32)

    @pl.when(k == pl.num_programs(2) - 1)
    def _writeback():
        o_ref[...] = acc_ref[...].astype(o_ref.dtype)


# ---------------------------------------------------------------------------
# Wrapper
# ---------------------------------------------------------------------------
def gconvolution_forward(inputs, adj, weight, *, in_features, num_nodes,
                         out_features, bias=None):
    """Pallas implementation of GConvolution.forward (fused bmm + mm)."""
    b = inputs.shape[0]
    f, n, o = in_features, num_nodes, out_features
    fo = f * o

    cap = _vmem_capacity_bytes()
    budget = int(cap * 0.70)                       # tile working-set budget
    vmem_limit = int(max(32 * 1024 * 1024, (cap * 15) // 16))

    # Pad awkward batch / output-column sizes so blocks stay lane/sublane dense.
    b_pad = _maybe_pad(b, 8, 32)
    fo_pad = _maybe_pad(fo, 128, 1024)

    bt, fk, tn = _pick_tiles(b_pad, f, n, fo_pad, budget)
    grid = (b_pad // bt, fo_pad // tn, f // fk)
    n_k = grid[2]

    # bf16 operands for the MXU; accumulation stays f32 inside the kernel.
    x16 = inputs.astype(jnp.bfloat16)
    a16 = adj.astype(jnp.bfloat16)
    w16 = weight.astype(jnp.bfloat16)
    if b_pad != b:
        x16 = jnp.pad(x16, ((0, b_pad - b), (0, 0), (0, 0)))
        a16 = jnp.pad(a16, ((0, b_pad - b), (0, 0), (0, 0)))
    if fo_pad != fo:
        w16 = jnp.pad(w16, ((0, 0), (0, fo_pad - fo)))

    cost = pl.CostEstimate(
        flops=int(2 * b_pad * f * n * n + 2 * b_pad * f * n * fo_pad),
        transcendentals=0,
        bytes_accessed=int(x16.size * 2 + a16.size * 2
                           + w16.size * 2 * (b_pad // bt) + b_pad * fo_pad * 4),
    )

    te = pl.pallas_call(
        _gconv_kernel,
        out_shape=jax.ShapeDtypeStruct((b_pad, fo_pad), jnp.float32),
        grid_spec=pltpu.PrefetchScalarGridSpec(
            num_scalar_prefetch=0,
            grid=grid,
            in_specs=[
                pl.BlockSpec((bt, fk, n), lambda bi, ji, ki: (bi, ki, 0)),
                pl.BlockSpec((bt, n, n), lambda bi, ji, ki: (bi, 0, 0)),
                pl.BlockSpec((fk * n, tn), lambda bi, ji, ki: (ki, ji)),
            ],
            out_specs=pl.BlockSpec((bt, tn), lambda bi, ji, ki: (bi, ji)),
            scratch_shapes=[
                pltpu.VMEM((bt, tn), jnp.float32),             # f32 accumulator
                pltpu.VMEM((n_k, bt, fk * n), jnp.bfloat16),   # fg cache across j
            ],
        ),
        compiler_params=pltpu.CompilerParams(
            # j must stay "arbitrary": j > 0 steps reuse the fg cache written at
            # j == 0, so only the batch axis is safe to shard across cores.
            dimension_semantics=("parallel", "arbitrary", "arbitrary"),
            vmem_limit_bytes=vmem_limit,
        ),
        cost_estimate=cost,
    )(x16, a16, w16)

    outputs = te[:b, :fo].reshape(b, f, o)

    if bias is not None:
        # PyTorch bias has shape (num_nodes*out_features,); like the reference it
        # only broadcasts against (B, F, O) when num_nodes == 1.
        outputs = outputs + bias
    return outputs


def init_weight(key, in_features, num_nodes, out_features):
    # nn.init.kaiming_uniform_ (default: a=0, fan_in mode, leaky_relu gain=sqrt(2))
    shape = (in_features * num_nodes, in_features * out_features)
    fan_in = shape[1]
    gain = math.sqrt(2.0)
    bound = gain * math.sqrt(3.0 / fan_in)
    return jax.random.uniform(key, shape, jnp.float32, -bound, bound)


if __name__ == "__main__":
    B = 2
    in_features = 4
    num_nodes = 8
    out_features = 4

    key = jax.random.PRNGKey(0)
    k_x, k_a, k_w = jax.random.split(key, 3)

    inputs = jax.random.normal(k_x, (B, in_features, num_nodes), jnp.float32)
    adj = jax.random.normal(k_a, (B, num_nodes, num_nodes), jnp.float32)
    weight = init_weight(k_w, in_features, num_nodes, out_features)
    # use_bias defaults to 0.0 (falsy) in the PyTorch module -> no bias applied.

    out = gconvolution_forward(
        inputs, adj, weight,
        in_features=in_features, num_nodes=num_nodes, out_features=out_features)
    out = jax.block_until_ready(out)

    # Reference with the same numerics as the kernel (bf16 operands, f32 accum).
    x16 = inputs.astype(jnp.bfloat16)
    a16 = adj.astype(jnp.bfloat16)
    w16 = weight.astype(jnp.bfloat16)
    fg_ref = jnp.einsum("bfn,bnm->bfm", x16, a16,
                        preferred_element_type=jnp.float32).astype(jnp.bfloat16)
    te_ref = jnp.dot(fg_ref.reshape(B, num_nodes * in_features), w16,
                     preferred_element_type=jnp.float32)
    ref = te_ref.reshape(B, in_features, out_features)

    # Pure-f32 reference (loose check: bf16 rounding of operands is expected).
    fg32 = jnp.einsum("bfn,bnm->bfm", inputs, adj)
    ref32 = (fg32.reshape(B, -1) @ weight).reshape(B, in_features, out_features)

    assert out.shape == (B, in_features, out_features)
    assert out.dtype == jnp.float32
    assert jnp.allclose(out, ref, atol=1e-3, rtol=1e-3), \
        float(jnp.max(jnp.abs(out - ref)))
    assert jnp.allclose(out, ref32, atol=0.25, rtol=0.05)
    print("KERNEL_OK")
</pallas_src>

<mosaic_0001>
module attributes {stable_mosaic.version = 11 : i64} {
  func.func @_gconv_kernel(%arg0: i32, %arg1: i32, %arg2: i32, %arg3: memref<2x4x8xbf16, #tpu.memory_space<vmem>>, %arg4: memref<2x8x8xbf16, #tpu.memory_space<vmem>>, %arg5: memref<32x16xbf16, #tpu.memory_space<vmem>>, %arg6: memref<2x16xf32, #tpu.memory_space<vmem>>, %arg7: memref<2x16xf32, #tpu.memory_space<vmem>>, %arg8: memref<1x2x32xbf16, #tpu.memory_space<vmem>>) attributes {dimension_semantics = [#tpu.dimension_semantics<parallel>, #tpu.dimension_semantics<arbitrary>, #tpu.dimension_semantics<arbitrary>], iteration_bounds = array<i64: 1, 1, 1>, scalar_prefetch = 0 : i64, scratch_operands = 2 : i64, tpu.core_type = #tpu.core_type<tc>, window_params = [{transform_indices = @transform_0, window_bounds = array<i64: 2, 4, 8>}, {transform_indices = @transform_1, window_bounds = array<i64: 2, 8, 8>}, {transform_indices = @transform_2, window_bounds = array<i64: 32, 16>}, {transform_indices = @transform_3, window_bounds = array<i64: 2, 16>}]} {
    %c0_i32 = arith.constant 0 : i32
    %0 = arith.cmpi eq, %arg2, %c0_i32 : i32
    %1 = arith.extui %0 : i1 to i32
    %c0_i32_0 = arith.constant 0 : i32
    %2 = arith.cmpi ne, %1, %c0_i32_0 : i32
    scf.if %2 {
      %cst_12 = arith.constant 0.000000e+00 : f32
      %17 = vector.broadcast %cst_12 : f32 to vector<2x16xf32>
      %c0_13 = arith.constant 0 : index
      %c0_14 = arith.constant 0 : index
      %18 = vector.load %arg7[%c0_13, %c0_14] : memref<2x16xf32, #tpu.memory_space<vmem>>, vector<2x16xf32>
      tpu.vector_store %arg7[%c0_13, %c0_14], %17 {strides = array<i32>} : memref<2x16xf32, #tpu.memory_space<vmem>>, vector<2x16xf32>,
    } else {
    }
    %c0_i32_1 = arith.constant 0 : i32
    %3 = arith.cmpi eq, %arg1, %c0_i32_1 : i32
    %4 = arith.extui %3 : i1 to i32
    %c0_i32_2 = arith.constant 0 : i32
    %5 = arith.cmpi ne, %4, %c0_i32_2 : i32
    scf.if %5 {
      %c0_12 = arith.constant 0 : index
      %c0_13 = arith.constant 0 : index
      %c0_14 = arith.constant 0 : index
      %17 = vector.load %arg3[%c0_12, %c0_13, %c0_14] : memref<2x4x8xbf16, #tpu.memory_space<vmem>>, vector<2x4x8xbf16>
      %c0_15 = arith.constant 0 : index
      %c0_16 = arith.constant 0 : index
      %c0_17 = arith.constant 0 : index
      %18 = vector.load %arg4[%c0_15, %c0_16, %c0_17] : memref<2x8x8xbf16, #tpu.memory_space<vmem>>, vector<2x8x8xbf16>
      "tpu.trace_start"() <{level = 10 : i32, message = "bfn,bnm->bfm"}> : () -> ()
      %cst_18 = arith.constant dense<0.000000e+00> : vector<2x4x8xf32>
      %19 = tpu.matmul %17, %18, %cst_18 {dimension_numbers = #tpu.dot_dimension_numbers<[2], [1], [1], [2], [0, 0, 0, 1, 1, 2], [0], [0]>} : vector<2x4x8xbf16>, vector<2x8x8xbf16>, vector<2x4x8xf32> -> vector<2x4x8xf32>
      "tpu.trace_stop"() : () -> ()
      %20 = arith.truncf %19 : vector<2x4x8xf32> to vector<2x4x8xbf16>
      %21 = vector.extract_strided_slice %20 {offsets = [0, 0, 0], sizes = [2, 1, 8], strides = [1, 1, 1]} : vector<2x4x8xbf16> to vector<2x1x8xbf16>
      %22 = vector.shape_cast %21 : vector<2x1x8xbf16> to vector<2x8xbf16>
      %23 = arith.index_cast %arg2 : i32 to index
      %c0_19 = arith.constant 0 : index
      %c0_20 = arith.constant 0 : index
      %24 = vector.load %arg8[%23, %c0_19, %c0_20] : memref<1x2x32xbf16, #tpu.memory_space<vmem>>, vector<1x2x8xbf16>
      %25 = vector.shape_cast %24 : vector<1x2x8xbf16> to vector<2x8xbf16>
      %26 = vector.shape_cast %22 : vector<2x8xbf16> to vector<1x2x8xbf16>
      tpu.vector_store %arg8[%23, %c0_19, %c0_20], %26 {strides = array<i32>} : memref<1x2x32xbf16, #tpu.memory_space<vmem>>, vector<1x2x8xbf16>,
      %27 = vector.extract_strided_slice %20 {offsets = [0, 1, 0], sizes = [2, 1, 8], strides = [1, 1, 1]} : vector<2x4x8xbf16> to vector<2x1x8xbf16>
      %28 = vector.shape_cast %27 : vector<2x1x8xbf16> to vector<2x8xbf16>
      %29 = arith.index_cast %arg2 : i32 to index
      %c0_21 = arith.constant 0 : index
      %c8 = arith.constant 8 : index
      %30 = vector.load %arg8[%29, %c0_21, %c8] : memref<1x2x32xbf16, #tpu.memory_space<vmem>>, vector<1x2x8xbf16>
      %31 = vector.shape_cast %30 : vector<1x2x8xbf16> to vector<2x8xbf16>
      %32 = vector.shape_cast %28 : vector<2x8xbf16> to vector<1x2x8xbf16>
      tpu.vector_store %arg8[%29, %c0_21, %c8], %32 {strides = array<i32>} : memref<1x2x32xbf16, #tpu.memory_space<vmem>>, vector<1x2x8xbf16>,
      %33 = vector.extract_strided_slice %20 {offsets = [0, 2, 0], sizes = [2, 1, 8], strides = [1, 1, 1]} : vector<2x4x8xbf16> to vector<2x1x8xbf16>
      %34 = vector.shape_cast %33 : vector<2x1x8xbf16> to vector<2x8xbf16>
      %35 = arith.index_cast %arg2 : i32 to index
      %c0_22 = arith.constant 0 : index
      %c16 = arith.constant 16 : index
      %36 = vector.load %arg8[%35, %c0_22, %c16] : memref<1x2x32xbf16, #tpu.memory_space<vmem>>, vector<1x2x8xbf16>
      %37 = vector.shape_cast %36 : vector<1x2x8xbf16> to vector<2x8xbf16>
      %38 = vector.shape_cast %34 : vector<2x8xbf16> to vector<1x2x8xbf16>
      tpu.vector_store %arg8[%35, %c0_22, %c16], %38 {strides = array<i32>} : memref<1x2x32xbf16, #tpu.memory_space<vmem>>, vector<1x2x8xbf16>,
      %39 = vector.extract_strided_slice %20 {offsets = [0, 3, 0], sizes = [2, 1, 8], strides = [1, 1, 1]} : vector<2x4x8xbf16> to vector<2x1x8xbf16>
      %40 = vector.shape_cast %39 : vector<2x1x8xbf16> to vector<2x8xbf16>
      %41 = arith.index_cast %arg2 : i32 to index
      %c0_23 = arith.constant 0 : index
      %c24 = arith.constant 24 : index
      %42 = vector.load %arg8[%41, %c0_23, %c24] : memref<1x2x32xbf16, #tpu.memory_space<vmem>>, vector<1x2x8xbf16>
      %43 = vector.shape_cast %42 : vector<1x2x8xbf16> to vector<2x8xbf16>
      %44 = vector.shape_cast %40 : vector<2x8xbf16> to vector<1x2x8xbf16>
      tpu.vector_store %arg8[%41, %c0_23, %c24], %44 {strides = array<i32>} : memref<1x2x32xbf16, #tpu.memory_space<vmem>>, vector<1x2x8xbf16>,
    } else {
    }
    %c0 = arith.constant 0 : index
    %c0_3 = arith.constant 0 : index
    %6 = vector.load %arg7[%c0, %c0_3] : memref<2x16xf32, #tpu.memory_space<vmem>>, vector<2x16xf32>
    %7 = arith.index_cast %arg2 : i32 to index
    %c0_4 = arith.constant 0 : index
    %c0_5 = arith.constant 0 : index
    %8 = vector.load %arg8[%7, %c0_4, %c0_5] : memref<1x2x32xbf16, #tpu.memory_space<vmem>>, vector<1x2x32xbf16>
    %9 = vector.shape_cast %8 : vector<1x2x32xbf16> to vector<2x32xbf16>
    %c0_6 = arith.constant 0 : index
    %c0_7 = arith.constant 0 : index
    %10 = vector.load %arg5[%c0_6, %c0_7] : memref<32x16xbf16, #tpu.memory_space<vmem>>, vector<32x16xbf16>
    %cst = arith.constant dense<0.000000e+00> : vector<2x16xf32>
    %11 = tpu.matmul %9, %10, %cst {dimension_numbers = #tpu.dot_dimension_numbers<[1], [0], [0], [1], [0, 0, 1, 1], [], []>} : vector<2x32xbf16>, vector<32x16xbf16>, vector<2x16xf32> -> vector<2x16xf32>
    %12 = arith.addf %6, %11 : vector<2x16xf32>
    %c0_8 = arith.constant 0 : index
    %c0_9 = arith.constant 0 : index
    %13 = vector.load %arg7[%c0_8, %c0_9] : memref<2x16xf32, #tpu.memory_space<vmem>>, vector<2x16xf32>
    tpu.vector_store %arg7[%c0_8, %c0_9], %12 {strides = array<i32>} : memref<2x16xf32, #tpu.memory_space<vmem>>, vector<2x16xf32>,
    %c0_i32_10 = arith.constant 0 : i32
    %14 = arith.cmpi eq, %arg2, %c0_i32_10 : i32
    %15 = arith.extui %14 : i1 to i32
    %c0_i32_11 = arith.constant 0 : i32
    %16 = arith.cmpi ne, %15, %c0_i32_11 : i32
    scf.if %16 {
      %c0_12 = arith.constant 0 : index
      %c0_13 = arith.constant 0 : index
      %17 = vector.load %arg7[%c0_12, %c0_13] : memref<2x16xf32, #tpu.memory_space<vmem>>, vector<2x16xf32>
      %c0_14 = arith.constant 0 : index
      %c0_15 = arith.constant 0 : index
      %18 = vector.load %arg6[%c0_14, %c0_15] : memref<2x16xf32, #tpu.memory_space<vmem>>, vector<2x16xf32>
      tpu.vector_store %arg6[%c0_14, %c0_15], %17 {strides = array<i32>} : memref<2x16xf32, #tpu.memory_space<vmem>>, vector<2x16xf32>,
    } else {
    }
    return
  }
  func.func @transform_0(%arg0: i32, %arg1: i32, %arg2: i32) -> (i32, i32, i32) {
    %c0_i32 = arith.constant 0 : i32
    %c0_i32_0 = arith.constant 0 : i32
    return %arg0, %arg2, %c0_i32 : i32, i32, i32
  }
  func.func @transform_1(%arg0: i32, %arg1: i32, %arg2: i32) -> (i32, i32, i32) {
    %c0_i32 = arith.constant 0 : i32
    %c0_i32_0 = arith.constant 0 : i32
    %c0_i32_1 = arith.constant 0 : i32
    return %arg0, %c0_i32, %c0_i32_0 : i32, i32, i32
  }
  func.func @transform_2(%arg0: i32, %arg1: i32, %arg2: i32) -> (i32, i32) {
    %c0_i32 = arith.constant 0 : i32
    return %arg2, %arg1 : i32, i32
  }
  func.func @transform_3(%arg0: i32, %arg1: i32, %arg2: i32) -> (i32, i32) {
    %c0_i32 = arith.constant 0 : i32
    return %arg0, %arg1 : i32, i32
  }
}

</mosaic_0001>

<bundles_post_ra>
// kernel: tpu_custom_call.1
= control target key start
LH: loop header
LB: loop body
LE: loop exit
PB: predicated region body
PF: predicated region fallthrough
CT: control target
= control target key end

     0   :  { %vm34_vm0 = vcmask 1043456   ;;  %v469_v2 = vmov 0.0   ;;  %vm30_vm1 = vcmask 64512   ;;  %vm470_vm2 = vmmov 0   ;;  %s558_s0 = inlined_call_operand.vmem [shape: bf16[2,4,8], index: 0, kind: input, shape index: {}]   ;;  %s559_s1 = inlined_call_operand.vmem [shape: bf16[2,8,8], index: 1, kind: input, shape index: {}]   ;;  %s560_s2 = inlined_call_operand.vmem [shape: bf16[32,16], index: 2, kind: input, shape index: {}]   ;;  %s561_s3 = inlined_call_operand.hbm [shape: f32[2,16], index: 3, kind: output, shape index: {}]  }
   0x1   :  { %v28_v0 = vld [vmem:[%s559_s1] sm:$0xf]  ;;  %v29_v1 = vld [vmem:[%s559_s1 + $0x4] sm:$0xf]  ;;  %415 = vmatprep.subr.bf16.mxu0 %v469_v2  ;;  %421 = vmatprep.subr.bf16.mxu1 %v469_v2 }
   0x2   :  { %v36_v3 = vsel %vm34_vm0, %v28_v0, 0  ;;  %v82_v4 = vsel %vm34_vm0, %v29_v1, 0  ;;  %v26_v5 = vld [vmem:[%s558_s0] sm:$0x3]  ;;  %v27_v6 = vld [vmem:[%s558_s0 + $0x2] sm:$0x3]  ;;  %417 = vmatprep.mubr.msk.bf16.mxu0 %vm470_vm2, %v469_v2  ;;  %423 = vmatprep.mubr.msk.bf16.mxu1 %vm470_vm2, %v469_v2 }
   0x3   :  { %416 = vmatpush3.bf16.msra.mxu0 %v36_v3  ;;  %422 = vmatpush3.bf16.msra.mxu1 %v82_v4 }
   0x4   :  { %8 = vsyncpa [#allocation5], 0  ;;  %427 = vmatprep.subr.bf16.mxu0 %v469_v2  ;;  %v471_v7 = vmov 1966171168   ;;  %v131_v9 = vlaneseq  ;;  %v472_v12 = vmov 1935823168  }
   0x5   :  { %v129_v8 = vunpack.c.l.s4 %v471_v7  ;;  %v157_v13 = vunpack.c.l.s4 %v472_v12  ;;  %vm187_vm3 = vcmask 1041409   ;;  %v443_v49 = vld [vmem:[%s560_s2] sm:$0xff]   ;;  %v444_v54 = vld [vmem:[%s560_s2 + $0x8] sm:$0xff]   ;;  %vm205_vm4 = vcmask 57344   ;;  %s473_s2 = smov 8   ;;  %s474_s22 = smov 24  }
   0x6   :  { %418 = vmatmul.mubr.msk.bf16.vlgmr.msra.gmra.mrb[0].mxu0 %vm30_vm1, %v26_v5  ;;  %424 = vmatmul.mubr.msk.bf16.vlgmr.msra.gmra.mrb[0].mxu1 %vm30_vm1, %v27_v6  ;;  %v132_v11 = vshrl.u32 %v131_v9, 7  ;;  %vm20_vm5 = vcmask 123904   ;;  %s475_s23 = smov 16   ;;  %vm227_vm6 = vcmask 122944   ;;  %vm295_vm7 = vcmask 188544   ;;  %s476_s24 = smov [#allocation4]  }
   0x7   :  { %431 = vmatprep.mubr.msk.bf16.mxu0 %vm470_vm2, %v469_v2  ;;  %v130_v10 = vunpack.c.0.s8 %v129_v8  ;;  %v158_v15 = vunpack.c.0.s8 %v157_v13  ;;  %428 = vmatpush3.bf16.msra.mxu0 %v443_v49  ;;  %21 = vst.msk [vmem:[#allocation2] sm:$0x3] %vm20_vm5, %v469_v2  ;;  %vm317_vm8 = vcmask 254144   ;;  %vm337_vm9 = vcmask 261120   ;;  %s395_s25 = sshll.u32 %s476_s24, 4  ;;  %s396_s25 = int_to_ptr.vmem [resolvable:$true] %s395_s25 }
   0x8   :  { %429 = vmatprep.subr.bf16.mxu0 %v469_v2  ;;  %s445_s26 = scalar_lea.vmem %s396_s25, 32  ;;  %p450_p1 = scmp.lt.s32.totalorder %s396_s25, %s396_s25 }
   0x9   :  { %v515_v14 = vsub.s32 %v130_v10, %v132_v11  ;;  %v161_v25 = vsub.s32 %v158_v15, %v132_v11  ;;  %p446_p0 = scmp.ne.s32.totalorder %s396_s25, %s445_s26  ;;  %p451_p2 = scmp.lt.s32.totalorder %s445_s26, %s445_s26 }
   0xb   :  { %430 = vmatpush3.bf16.msra.mxu0 %v444_v54  ;;  %p452_p3 = por %p451_p2, %p450_p1 }
   0xd   :  { %p453_p4 = pnand %p452_p3, %p446_p0 }
   0xe   :  { %v319_v10 = vld [vmem:[#allocation2] sm:$0x3] }
  0xd9   :  { %v72_v16 = vpop.f32.mrb[0].mxu0  ;;  %v118_v17 = vpop.f32.mrb[0].mxu1 }
  0xda   :  { %v124_v18 = vpack.c.bf16 %v72_v16, %v72_v16  ;;  %v125_v19 = vpack.c.bf16 %v118_v17, %v118_v17  ;;  %v419_v20 = vpop.f32.mrb[1].mxu0  ;;  %v425_v21 = vpop.f32.mrb[1].mxu1 }
  0xdb   :  { %v75_v22 = vpop.f32.mrb[2].mxu0  ;;  %v121_v23 = vpop.f32.mrb[2].mxu1 }
  0xdc   :  { %v134_v24 = vrot.slane %v124_v18, %v515_v14  ;;  %v148_v26 = vrot.slane %v125_v19, %v515_v14  ;;  %v420_v27 = vpop.f32.mrb[3].mxu0  ;;  %v426_v28 = vpop.f32.mrb[3].mxu1 }
  0xde   :  { %v141_v29 = vrot.slane %v134_v24, %v515_v14  ;;  %v229_v30 = vcombine.high %v134_v24, %v134_v24  ;;  %v155_v31 = vrot.slane %v148_v26, %v515_v14  ;;  %v237_v32 = vcombine.high %v148_v26, %v148_v26 }
  0xe0   :  { %v162_v33 = vrot.slane %v141_v29, %v161_v25  ;;  %v236_v34 = vrot.slane %v229_v30, %v515_v14  ;;  %v176_v35 = vrot.slane %v155_v31, %v161_v25  ;;  %v244_v36 = vrot.slane %v237_v32, %v515_v14 }
  0xe2   :  { %v169_v37 = vrot.slane %v162_v33, %v161_v25  ;;  %v251_v38 = vrot.slane %v236_v34, %v161_v25  ;;  %v183_v39 = vrot.slane %v176_v35, %v161_v25  ;;  %v265_v40 = vrot.slane %v244_v36, %v161_v25 }
  0xe4   :  { %v184_v41 = vunpack.c.l.b16 %v169_v37  ;;  %v258_v42 = vrot.slane %v251_v38, %v161_v25  ;;  %v185_v43 = vunpack.c.l.b16 %v183_v39  ;;  %v272_v44 = vrot.slane %v265_v40, %v161_v25 }
  0xe6   :  { %v273_v45 = vunpack.c.l.b16 %v258_v42  ;;  %v186_v46 = vrot.slane %v185_v43, 7  ;;  %v207_v47 = vrot.slane %v184_v41, 1  ;;  %v274_v48 = vunpack.c.l.b16 %v272_v44 }
  0xe8   :  { %v208_v50 = vsel %vm187_vm3, %v185_v43, %v207_v47  ;;  %v275_v51 = vrot.slane %v274_v48, 7  ;;  %v297_v52 = vrot.slane %v273_v45, 1  ;;  %v188_v53 = vsel %vm187_vm3, %v186_v46, %v184_v41 }
  0xe9   :  { %v209_v55 = vpack.c.b16 %v208_v50, %v208_v50  ;;  %v189_v56 = vpack.c.b16 %v188_v53, %v188_v53 }
  0xea   :  { %v298_v57 = vsel %vm187_vm3, %v274_v48, %v297_v52  ;;  %v276_v58 = vsel %vm187_vm3, %v275_v51, %v273_v45 }
  0xeb   :  { %v216_v59 = vrot.slane %v209_v55, %v515_v14  ;;  %v299_v60 = vpack.c.b16 %v298_v57, %v298_v57  ;;  %v277_v61 = vpack.c.b16 %v276_v58, %v276_v58  ;;  %v196_v62 = vrot.slane %v189_v56, %v515_v14 }
  0xed   :  { %v223_v63 = vrot.slane %v216_v59, %v515_v14  ;;  %v306_v0 = vrot.slane %v299_v60, %v515_v14  ;;  %v284_v1 = vrot.slane %v277_v61, %v515_v14  ;;  %v203_v3 = vrot.slane %v196_v62, %v515_v14 }
  0xef   :  { %224 = vrot.lane.b32.xlu0 %v223_v63, %s473_s2  ;;  %v313_v4 = vrot.slane %v306_v0, %v515_v14  ;;  %206 = vst.msk [vmem:[#allocation3] sm:$0x1] %vm205_vm4, %v203_v3  ;;  %v291_v5 = vrot.slane %v284_v1, %v515_v14 }
  0xf1   :  { %314 = vrot.lane.b32.xlu1 %v313_v4, %s474_s22 }
  0xf3   :  { %292 = vrot.lane.b32.xlu0 %v291_v5, %s475_s23 }
 0x161   :  { %v225_v6 = vpop.permute.xlu0 %224 }
 0x162   :  { %228 = vst.msk [vmem:[#allocation3] sm:$0x1] %vm227_vm6, %v225_v6 }
 0x163   :  { %v315_v8 = vpop.permute.xlu1 %314 }
 0x165   :  { %v293_v7 = vpop.permute.xlu0 %292 }
 0x166   :  { %296 = vst.msk [vmem:[#allocation3] sm:$0x1] %vm295_vm7, %v293_v7 }
 0x167   :  { %318 = vst.msk [vmem:[#allocation3] sm:$0x1] %vm317_vm8, %v315_v8 }
 0x16e   :  { %v320_v9 = vld [vmem:[#allocation3] sm:$0x1] }
 0x16f   :  { %432 = vmatmul.mubr.msk.bf16.vlgmr.msra.gmra.mrb[4].mxu0 %vm337_vm9, %v320_v9 }
 0x242   :  { %v375_v2 = vpop.f32.mrb[4].mxu0 }
 0x243   :  { %v381_v11 = vadd.f32 %v375_v2, %v319_v10  ;;  %v433_v12 = vpop.f32.mrb[5].mxu0 }
 0x244   :  { %v378_v13 = vpop.f32.mrb[6].mxu0 }
 0x245   :  { %383 = vst.msk [vmem:[#allocation2] sm:$0x3] %vm20_vm5, %v381_v11  ;;  %v434_v14 = vpop.f32.mrb[7].mxu0 }
 0x24c   :  { %v387_v15 = vld [vmem:[#allocation2] sm:$0x3] }
 0x24d   :  { %388 = vst.msk [vmem:[#allocation4] sm:$0x3] %vm20_vm5, %v387_v15 }
 0x24e   :  { %456 = shalt.err (!%p453_p4)
}
 0x24f   :  { %s457_s29 = scalar_lea.hbm %s561_s3, 32 }
 0x250   :  { %p458_p5 = scmp.ne.s32.totalorder %s561_s3, %s457_s29  ;;  %p461_p6 = scmp.lt.u32.totalorder %s457_s29, %s561_s3 }
 0x252   :  { %p463_p7 = pnand %p461_p6, %p458_p5 }
 0x254   :  { %466 = shalt.err (!%p463_p7)
}
 0x255   :  { %398 = dma.vmem_to_hbm [thread:$0]  %s396_s25, 32, %s561_s3, [#allocation5]  }
 0x256   :  { %467 = dma.done.wait [#allocation5], 32  }
 0x257   :  { %468 = vsyncadd [#allocation5], 4294967264 }
 0x258   :  { %402 = vsyncpa [#allocation5], 1 }

</bundles_post_ra>
